<compile_context>
chip_gen: v7x
topology: tpu7x:2x2x1
jax: 0.10.0
libtpu: 0.0.40
codegen_flags: <defaults>
</compile_context>

<pallas_src>
import jax
import jax.numpy as jnp
from jax import lax
from jax.experimental import pallas as pl
from jax.experimental.pallas import tpu as pltpu


def _round_up(x, m):
    return -(-x // m) * m


def _vmem_capacity_bytes():
    try:
        info = pltpu.get_tpu_info()
        cap = getattr(info, "vmem_capacity_bytes", None)
        if cap:
            return int(cap)
    except Exception:
        pass
    return 64 << 20          # conservative default: v7x has 64 MiB per TensorCore


def _vmem_limit_bytes(Cin_pad, Cout, HWP, THW, WIN, out_itemsize):
    """Budget derived from the actual allocations (double-buffered), with margin."""
    x_buf = 2 * Cin_pad * _round_up(HWP, 128) * 2                  # bf16 image block
    w_buf = 2 * _round_up(Cout, 16) * _round_up(9 * Cin_pad, 128) * 2
    b_buf = 2 * _round_up(Cout, 8) * 128 * 4
    m_buf = 2 * 8 * _round_up(THW, 128) * 4
    o_buf = 2 * _round_up(Cout, 8) * _round_up(THW, 128) * out_itemsize
    patch = _round_up(9 * Cin_pad, 16) * _round_up(THW, 128) * 2   # im2col scratch
    window = Cin_pad * _round_up(WIN, 128) * 2                     # windowed load (if spilled)
    need = x_buf + w_buf + b_buf + m_buf + o_buf + patch + window
    cap = _vmem_capacity_bytes()
    return int(min(max(2 * need, 16 << 20), (cap * 3) // 4))


def _pick_row_tile(H, W, Cin_pad):
    """Row-tile height TH: TH*W lane-dense (mult of MXU N), >=1K lanes, bounded scratch."""
    max_lanes = max(256, (8 << 20) // (2 * 9 * Cin_pad))           # patch <= ~8 MiB
    divisors = [d for d in range(1, H + 1) if H % d == 0]
    for lane_mult, lane_min in ((256, 1024), (128, 512)):
        for d in divisors:
            thw = d * W
            if thw % lane_mult == 0 and lane_min <= thw <= max_lanes:
                return d
    return H   # small map: whole image in one grid step (block == full array dims)


def _make_kernel(W, TH, Cin_pad, n_row_tiles):
    THW = TH * W
    WIN = THW + 2 * W + 2        # (TH+2)-row window of the (W+1)-zero-padded flat image

    def kernel(x_ref, w_ref, b_ref, m_ref, o_ref, patch_ref):
        # x_ref:     (1, Cin_pad, HW+2W+2) bf16 padded image (resident across row tiles)
        # w_ref:     (Cout, 9*Cin_pad)     bf16 BN-scale-folded conv weights
        # b_ref:     (Cout, 1)             f32  folded BN shift
        # m_ref:     (8, TH*W)             f32  row0: left-neighbour ok, row1: right ok
        # o_ref:     (1, Cout, TH*W)       one lane-dense output row tile
        # patch_ref: (9*Cin_pad, TH*W)     bf16 per-tile im2col scratch
        r = pl.program_id(1)

        # One aligned windowed load per tile; padding supplies the top/bottom halo.
        if n_row_tiles == 1:
            win = x_ref[0]                                       # (Cin_pad, WIN)
        else:
            start = pl.multiple_of(r * THW, 128)                 # THW % 128 == 0 here
            win = x_ref[0, :, pl.ds(start, WIN)]

        lmask = m_ref[0:1, :] > 0.0                              # column x-1 exists
        rmask = m_ref[1:2, :] > 0.0                              # column x+1 exists
        zero = jnp.zeros((), win.dtype)

        # Per-tile im2col: 9 static slices of the window, column-masked, bf16 stores.
        for ky in range(3):
            for kx in range(3):
                t = ky * 3 + kx
                c = ky * W + kx                                  # static offset in [0, 2W+2]
                tap = win[:, c:c + THW]
                if kx == 0:
                    tap = jnp.where(lmask, tap, zero)
                elif kx == 2:
                    tap = jnp.where(rmask, tap, zero)
                patch_ref[t * Cin_pad:(t + 1) * Cin_pad, :] = tap

        # One MXU matmul per tile: (Cout, 9*Cin_pad) x (9*Cin_pad, TH*W), f32 acc.
        acc = lax.dot_general(
            w_ref[...], patch_ref[...],
            dimension_numbers=(((1,), (0,)), ((), ())),
            preferred_element_type=jnp.float32)

        y = jnp.maximum(acc + b_ref[...], 0.0)                   # folded BN shift + ReLU
        o_ref[0] = y.astype(o_ref.dtype)

    return kernel, WIN


def fused_conv3x3_bn_relu(x_nchw, weight, gamma, beta, running_mean, running_var,
                          eps=1e-5, out_dtype=jnp.float32):
    """Fused Conv2d(3x3, pad=1, bias=False) + BatchNorm2d(eval) + ReLU. NCHW in/out."""
    N, Cin, H, W = x_nchw.shape
    Cout = weight.shape[0]
    HW = H * W

    # ---- fold eval-mode BN into the conv weight (scale) and a bias (shift) ------
    scale = gamma / jnp.sqrt(running_var + eps)                    # (Cout,)
    shift = beta - running_mean * scale                            # (Cout,)
    w_folded = weight.astype(jnp.float32) * scale[:, None, None, None]

    # ---- pad Cin so every im2col tap slab is bf16-sublane aligned ---------------
    Cin_pad = _round_up(Cin, 16)
    if Cin_pad != Cin:
        w_folded = jnp.pad(w_folded, ((0, 0), (0, Cin_pad - Cin), (0, 0), (0, 0)))
    # K order: tap (ky*3 + kx) major, channel minor
    w2 = jnp.transpose(w_folded, (0, 2, 3, 1)).reshape(Cout, 9 * Cin_pad)
    w2 = w2.astype(jnp.bfloat16)
    bias = shift.reshape(Cout, 1).astype(jnp.float32)

    # ---- bf16 NCHW image; H,W flattened to one lane axis; (W+1) zero pad each end
    x_flat = x_nchw.reshape(N, Cin, HW).astype(jnp.bfloat16)
    if Cin_pad != Cin:
        x_flat = jnp.pad(x_flat, ((0, 0), (0, Cin_pad - Cin), (0, 0)))
    x_flat = jnp.pad(x_flat, ((0, 0), (0, 0), (W + 1, W + 1)))
    HWP = HW + 2 * W + 2

    TH = _pick_row_tile(H, W, Cin_pad)
    THW = TH * W
    n_row_tiles = H // TH

    # ---- column-boundary masks (periodic in W, same for every row tile) ---------
    col = jnp.tile(jnp.arange(W, dtype=jnp.int32), TH)
    masks = jnp.zeros((8, THW), jnp.float32)
    masks = masks.at[0, :].set((col != 0).astype(jnp.float32))      # left neighbour ok
    masks = masks.at[1, :].set((col != W - 1).astype(jnp.float32))  # right neighbour ok

    kernel, WIN = _make_kernel(W, TH, Cin_pad, n_row_tiles)
    vmem_limit = _vmem_limit_bytes(Cin_pad, Cout, HWP, THW, WIN,
                                   jnp.dtype(out_dtype).itemsize)

    out_flat = pl.pallas_call(
        kernel,
        out_shape=jax.ShapeDtypeStruct((N, Cout, HW), out_dtype),
        grid_spec=pltpu.PrefetchScalarGridSpec(
            num_scalar_prefetch=0,
            grid=(N, n_row_tiles),
            in_specs=[
                # full padded image; index_map constant in r -> DMA'd once per image
                pl.BlockSpec((1, Cin_pad, HWP), lambda n, r: (n, 0, 0)),
                pl.BlockSpec((Cout, 9 * Cin_pad), lambda n, r: (0, 0)),
                pl.BlockSpec((Cout, 1), lambda n, r: (0, 0)),
                pl.BlockSpec((8, THW), lambda n, r: (0, 0)),
            ],
            out_specs=pl.BlockSpec((1, Cout, THW), lambda n, r: (n, 0, r)),
            scratch_shapes=[pltpu.VMEM((9 * Cin_pad, THW), jnp.bfloat16)],
        ),
        compiler_params=pltpu.CompilerParams(
            # no cross-step scratch dependency -> both axes parallel (megacore / v7x)
            dimension_semantics=("parallel", "parallel"),
            vmem_limit_bytes=vmem_limit),
    )(x_flat, w2, bias, masks)

    return out_flat.reshape(N, Cout, H, W)


def _reference(x_nchw, weight, gamma, beta, running_mean, running_var, eps=1e-5):
    y = lax.conv_general_dilated(
        x_nchw, weight, window_strides=(1, 1), padding=((1, 1), (1, 1)),
        dimension_numbers=("NCHW", "OIHW", "NCHW"))
    scale = (gamma / jnp.sqrt(running_var + eps)).reshape(1, -1, 1, 1)
    shift = (beta - running_mean * gamma / jnp.sqrt(running_var + eps)).reshape(1, -1, 1, 1)
    return jnp.maximum(y * scale + shift, 0.0)


if __name__ == "__main__":
    key = jax.random.PRNGKey(0)

    def make_inputs(k, N, Cin, Cout, H, W):
        ks = jax.random.split(k, 6)
        x = jax.random.normal(ks[0], (N, Cin, H, W), dtype=jnp.float32)
        weight = jax.random.normal(ks[1], (Cout, Cin, 3, 3), dtype=jnp.float32) * 0.1
        gamma = jax.random.uniform(ks[2], (Cout,), minval=0.5, maxval=1.5)
        beta = jax.random.normal(ks[3], (Cout,)) * 0.1
        mean = jax.random.normal(ks[4], (Cout,)) * 0.1
        var = jax.random.uniform(ks[5], (Cout,), minval=0.5, maxval=1.5)
        return x, weight, gamma, beta, mean, var

    k1, k2 = jax.random.split(key)

    # 1) tiny GCM-like block: whole image collapses to one grid step per image.
    x, w, g, b, m, v = make_inputs(k1, 2, 4, 8, 16, 16)
    out = jax.block_until_ready(fused_conv3x3_bn_relu(x, w, g, b, m, v))
    ref = _reference(x, w, g, b, m, v)
    assert out.shape == (2, 8, 16, 16)
    assert jnp.allclose(out, ref, atol=5e-2, rtol=5e-2), "mismatch vs reference (test 1)"

    # 2) multi-row-tile path (4 tiles), Cin not a multiple of the pad, bf16 output.
    x, w, g, b, m, v = make_inputs(k2, 1, 3, 8, 64, 64)
    out2 = jax.block_until_ready(
        fused_conv3x3_bn_relu(x, w, g, b, m, v, out_dtype=jnp.bfloat16))
    ref2 = _reference(x, w, g, b, m, v)
    assert out2.shape == (1, 8, 64, 64) and out2.dtype == jnp.bfloat16
    assert jnp.allclose(out2.astype(jnp.float32), ref2, atol=6e-2, rtol=6e-2), \
        "mismatch vs reference (test 2)"

    print("KERNEL_OK")
</pallas_src>

<mosaic_0001>
module attributes {stable_mosaic.version = 11 : i64} {
  func.func @kernel(%arg0: i32, %arg1: i32, %arg2: memref<1x16x290xbf16, #tpu.memory_space<vmem>>, %arg3: memref<8x144xbf16, #tpu.memory_space<vmem>>, %arg4: memref<8x1xf32, #tpu.memory_space<vmem>>, %arg5: memref<8x256xf32, #tpu.memory_space<vmem>>, %arg6: memref<1x8x256xf32, #tpu.memory_space<vmem>>, %arg7: memref<144x256xbf16, #tpu.memory_space<vmem>>) attributes {dimension_semantics = [#tpu.dimension_semantics<parallel>, #tpu.dimension_semantics<parallel>], iteration_bounds = array<i64: 2, 1>, scalar_prefetch = 0 : i64, scratch_operands = 1 : i64, tpu.core_type = #tpu.core_type<tc>, window_params = [{transform_indices = @transform_0, window_bounds = array<i64: 1, 16, 290>}, {pipeline_mode = #tpu.pipeline_mode<synchronous>, transform_indices = @transform_1, window_bounds = array<i64: 8, 144>}, {pipeline_mode = #tpu.pipeline_mode<synchronous>, transform_indices = @transform_2, window_bounds = array<i64: 8, 1>}, {pipeline_mode = #tpu.pipeline_mode<synchronous>, transform_indices = @transform_3, window_bounds = array<i64: 8, 256>}, {transform_indices = @transform_4, window_bounds = array<i64: 1, 8, 256>}]} {
    %c0 = arith.constant 0 : index
    %c0_0 = arith.constant 0 : index
    %c0_1 = arith.constant 0 : index
    %0 = vector.load %arg2[%c0, %c0_0, %c0_1] : memref<1x16x290xbf16, #tpu.memory_space<vmem>>, vector<1x16x290xbf16>
    %1 = vector.shape_cast %0 : vector<1x16x290xbf16> to vector<16x290xbf16>
    %c0_2 = arith.constant 0 : index
    %c0_3 = arith.constant 0 : index
    %2 = vector.load %arg5[%c0_2, %c0_3] : memref<8x256xf32, #tpu.memory_space<vmem>>, vector<1x256xf32>
    %cst = arith.constant 0.000000e+00 : f32
    %3 = vector.broadcast %cst : f32 to vector<1x256xf32>
    %4 = arith.cmpf ogt, %2, %3 : vector<1x256xf32>
    %c1 = arith.constant 1 : index
    %c0_4 = arith.constant 0 : index
    %5 = vector.load %arg5[%c1, %c0_4] : memref<8x256xf32, #tpu.memory_space<vmem>>, vector<1x256xf32>
    %cst_5 = arith.constant 0.000000e+00 : f32
    %6 = vector.broadcast %cst_5 : f32 to vector<1x256xf32>
    %7 = arith.cmpf ogt, %5, %6 : vector<1x256xf32>
    %8 = vector.extract_strided_slice %1 {offsets = [0, 0], sizes = [16, 256], strides = [1, 1]} : vector<16x290xbf16> to vector<16x256xbf16>
    %cst_6 = arith.constant 0.000000e+00 : bf16
    %9 = vector.shape_cast %4 : vector<1x256xi1> to vector<1x256xi1>
    %10 = vector.broadcast %9 : vector<1x256xi1> to vector<16x256xi1>
    %11 = vector.broadcast %cst_6 : bf16 to vector<16x256xbf16>
    %12 = arith.select %10, %8, %11 : vector<16x256xi1>, vector<16x256xbf16>
    %c0_7 = arith.constant 0 : index
    %c0_8 = arith.constant 0 : index
    %13 = vector.load %arg7[%c0_7, %c0_8] : memref<144x256xbf16, #tpu.memory_space<vmem>>, vector<16x256xbf16>
    tpu.vector_store %arg7[%c0_7, %c0_8], %12 {strides = array<i32>} : memref<144x256xbf16, #tpu.memory_space<vmem>>, vector<16x256xbf16>,
    %14 = vector.extract_strided_slice %1 {offsets = [0, 1], sizes = [16, 256], strides = [1, 1]} : vector<16x290xbf16> to vector<16x256xbf16>
    %c16 = arith.constant 16 : index
    %c0_9 = arith.constant 0 : index
    %15 = vector.load %arg7[%c16, %c0_9] : memref<144x256xbf16, #tpu.memory_space<vmem>>, vector<16x256xbf16>
    tpu.vector_store %arg7[%c16, %c0_9], %14 {strides = array<i32>} : memref<144x256xbf16, #tpu.memory_space<vmem>>, vector<16x256xbf16>,
    %16 = vector.extract_strided_slice %1 {offsets = [0, 2], sizes = [16, 256], strides = [1, 1]} : vector<16x290xbf16> to vector<16x256xbf16>
    %cst_10 = arith.constant 0.000000e+00 : bf16
    %17 = vector.shape_cast %7 : vector<1x256xi1> to vector<1x256xi1>
    %18 = vector.broadcast %17 : vector<1x256xi1> to vector<16x256xi1>
    %19 = vector.broadcast %cst_10 : bf16 to vector<16x256xbf16>
    %20 = arith.select %18, %16, %19 : vector<16x256xi1>, vector<16x256xbf16>
    %c32 = arith.constant 32 : index
    %c0_11 = arith.constant 0 : index
    %21 = vector.load %arg7[%c32, %c0_11] : memref<144x256xbf16, #tpu.memory_space<vmem>>, vector<16x256xbf16>
    tpu.vector_store %arg7[%c32, %c0_11], %20 {strides = array<i32>} : memref<144x256xbf16, #tpu.memory_space<vmem>>, vector<16x256xbf16>,
    %22 = vector.extract_strided_slice %1 {offsets = [0, 16], sizes = [16, 256], strides = [1, 1]} : vector<16x290xbf16> to vector<16x256xbf16>
    %cst_12 = arith.constant 0.000000e+00 : bf16
    %23 = vector.shape_cast %4 : vector<1x256xi1> to vector<1x256xi1>
    %24 = vector.broadcast %23 : vector<1x256xi1> to vector<16x256xi1>
    %25 = vector.broadcast %cst_12 : bf16 to vector<16x256xbf16>
    %26 = arith.select %24, %22, %25 : vector<16x256xi1>, vector<16x256xbf16>
    %c48 = arith.constant 48 : index
    %c0_13 = arith.constant 0 : index
    %27 = vector.load %arg7[%c48, %c0_13] : memref<144x256xbf16, #tpu.memory_space<vmem>>, vector<16x256xbf16>
    tpu.vector_store %arg7[%c48, %c0_13], %26 {strides = array<i32>} : memref<144x256xbf16, #tpu.memory_space<vmem>>, vector<16x256xbf16>,
    %28 = vector.extract_strided_slice %1 {offsets = [0, 17], sizes = [16, 256], strides = [1, 1]} : vector<16x290xbf16> to vector<16x256xbf16>
    %c64 = arith.constant 64 : index
    %c0_14 = arith.constant 0 : index
    %29 = vector.load %arg7[%c64, %c0_14] : memref<144x256xbf16, #tpu.memory_space<vmem>>, vector<16x256xbf16>
    tpu.vector_store %arg7[%c64, %c0_14], %28 {strides = array<i32>} : memref<144x256xbf16, #tpu.memory_space<vmem>>, vector<16x256xbf16>,
    %30 = vector.extract_strided_slice %1 {offsets = [0, 18], sizes = [16, 256], strides = [1, 1]} : vector<16x290xbf16> to vector<16x256xbf16>
    %cst_15 = arith.constant 0.000000e+00 : bf16
    %31 = vector.shape_cast %7 : vector<1x256xi1> to vector<1x256xi1>
    %32 = vector.broadcast %31 : vector<1x256xi1> to vector<16x256xi1>
    %33 = vector.broadcast %cst_15 : bf16 to vector<16x256xbf16>
    %34 = arith.select %32, %30, %33 : vector<16x256xi1>, vector<16x256xbf16>
    %c80 = arith.constant 80 : index
    %c0_16 = arith.constant 0 : index
    %35 = vector.load %arg7[%c80, %c0_16] : memref<144x256xbf16, #tpu.memory_space<vmem>>, vector<16x256xbf16>
    tpu.vector_store %arg7[%c80, %c0_16], %34 {strides = array<i32>} : memref<144x256xbf16, #tpu.memory_space<vmem>>, vector<16x256xbf16>,
    %36 = vector.extract_strided_slice %1 {offsets = [0, 32], sizes = [16, 256], strides = [1, 1]} : vector<16x290xbf16> to vector<16x256xbf16>
    %cst_17 = arith.constant 0.000000e+00 : bf16
    %37 = vector.shape_cast %4 : vector<1x256xi1> to vector<1x256xi1>
    %38 = vector.broadcast %37 : vector<1x256xi1> to vector<16x256xi1>
    %39 = vector.broadcast %cst_17 : bf16 to vector<16x256xbf16>
    %40 = arith.select %38, %36, %39 : vector<16x256xi1>, vector<16x256xbf16>
    %c96 = arith.constant 96 : index
    %c0_18 = arith.constant 0 : index
    %41 = vector.load %arg7[%c96, %c0_18] : memref<144x256xbf16, #tpu.memory_space<vmem>>, vector<16x256xbf16>
    tpu.vector_store %arg7[%c96, %c0_18], %40 {strides = array<i32>} : memref<144x256xbf16, #tpu.memory_space<vmem>>, vector<16x256xbf16>,
    %42 = vector.extract_strided_slice %1 {offsets = [0, 33], sizes = [16, 256], strides = [1, 1]} : vector<16x290xbf16> to vector<16x256xbf16>
    %c112 = arith.constant 112 : index
    %c0_19 = arith.constant 0 : index
    %43 = vector.load %arg7[%c112, %c0_19] : memref<144x256xbf16, #tpu.memory_space<vmem>>, vector<16x256xbf16>
    tpu.vector_store %arg7[%c112, %c0_19], %42 {strides = array<i32>} : memref<144x256xbf16, #tpu.memory_space<vmem>>, vector<16x256xbf16>,
    %44 = vector.extract_strided_slice %1 {offsets = [0, 34], sizes = [16, 256], strides = [1, 1]} : vector<16x290xbf16> to vector<16x256xbf16>
    %cst_20 = arith.constant 0.000000e+00 : bf16
    %45 = vector.shape_cast %7 : vector<1x256xi1> to vector<1x256xi1>
    %46 = vector.broadcast %45 : vector<1x256xi1> to vector<16x256xi1>
    %47 = vector.broadcast %cst_20 : bf16 to vector<16x256xbf16>
    %48 = arith.select %46, %44, %47 : vector<16x256xi1>, vector<16x256xbf16>
    %c128 = arith.constant 128 : index
    %c0_21 = arith.constant 0 : index
    %49 = vector.load %arg7[%c128, %c0_21] : memref<144x256xbf16, #tpu.memory_space<vmem>>, vector<16x256xbf16>
    tpu.vector_store %arg7[%c128, %c0_21], %48 {strides = array<i32>} : memref<144x256xbf16, #tpu.memory_space<vmem>>, vector<16x256xbf16>,
    %c0_22 = arith.constant 0 : index
    %c0_23 = arith.constant 0 : index
    %50 = vector.load %arg3[%c0_22, %c0_23] : memref<8x144xbf16, #tpu.memory_space<vmem>>, vector<8x144xbf16>
    %c0_24 = arith.constant 0 : index
    %c0_25 = arith.constant 0 : index
    %51 = vector.load %arg7[%c0_24, %c0_25] : memref<144x256xbf16, #tpu.memory_space<vmem>>, vector<144x256xbf16>
    %cst_26 = arith.constant dense<0.000000e+00> : vector<8x256xf32>
    %52 = tpu.matmul %50, %51, %cst_26 {dimension_numbers = #tpu.dot_dimension_numbers<[1], [0], [0], [1], [0, 0, 1, 1], [], []>} : vector<8x144xbf16>, vector<144x256xbf16>, vector<8x256xf32> -> vector<8x256xf32>
    %c0_27 = arith.constant 0 : index
    %c0_28 = arith.constant 0 : index
    %53 = vector.load %arg4[%c0_27, %c0_28] : memref<8x1xf32, #tpu.memory_space<vmem>>, vector<8x1xf32>
    %54 = vector.broadcast %53 : vector<8x1xf32> to vector<8x256xf32>
    %55 = arith.addf %52, %54 : vector<8x256xf32>
    %cst_29 = arith.constant 0.000000e+00 : f32
    %56 = vector.broadcast %cst_29 : f32 to vector<8x256xf32>
    %57 = arith.maximumf %55, %56 : vector<8x256xf32>
    %c0_30 = arith.constant 0 : index
    %c0_31 = arith.constant 0 : index
    %c0_32 = arith.constant 0 : index
    %58 = vector.load %arg6[%c0_30, %c0_31, %c0_32] : memref<1x8x256xf32, #tpu.memory_space<vmem>>, vector<1x8x256xf32>
    %59 = vector.shape_cast %58 : vector<1x8x256xf32> to vector<8x256xf32>
    %60 = vector.shape_cast %57 : vector<8x256xf32> to vector<1x8x256xf32>
    tpu.vector_store %arg6[%c0_30, %c0_31, %c0_32], %60 {strides = array<i32>} : memref<1x8x256xf32, #tpu.memory_space<vmem>>, vector<1x8x256xf32>,
    return
  }
  func.func @transform_0(%arg0: i32, %arg1: i32) -> (i32, i32, i32) {
    %c0_i32 = arith.constant 0 : i32
    %c0_i32_0 = arith.constant 0 : i32
    %c0_i32_1 = arith.constant 0 : i32
    return %arg0, %c0_i32, %c0_i32_0 : i32, i32, i32
  }
  func.func @transform_1(%arg0: i32, %arg1: i32) -> (i32, i32) {
    %c0_i32 = arith.constant 0 : i32
    %c0_i32_0 = arith.constant 0 : i32
    %c0_i32_1 = arith.constant 0 : i32
    return %c0_i32, %c0_i32_0 : i32, i32
  }
  func.func @transform_2(%arg0: i32, %arg1: i32) -> (i32, i32) {
    %c0_i32 = arith.constant 0 : i32
    %c0_i32_0 = arith.constant 0 : i32
    %c0_i32_1 = arith.constant 0 : i32
    return %c0_i32, %c0_i32_0 : i32, i32
  }
  func.func @transform_3(%arg0: i32, %arg1: i32) -> (i32, i32) {
    %c0_i32 = arith.constant 0 : i32
    %c0_i32_0 = arith.constant 0 : i32
    %c0_i32_1 = arith.constant 0 : i32
    return %c0_i32, %c0_i32_0 : i32, i32
  }
  func.func @transform_4(%arg0: i32, %arg1: i32) -> (i32, i32, i32) {
    %c0_i32 = arith.constant 0 : i32
    %c0_i32_0 = arith.constant 0 : i32
    return %arg0, %c0_i32, %arg1 : i32, i32, i32
  }
}

</mosaic_0001>

<bundles_post_ra>
// kernel: tpu_custom_call.1
= control target key start
LH: loop header
LB: loop body
LE: loop exit
PB: predicated region body
PF: predicated region fallthrough
CT: control target
= control target key end

     0   :  { %9 = vsyncpa [#allocation4], 0  ;;  %s1377_s0 = inlined_call_operand.hbm [shape: bf16[2,16,290], index: 0, kind: input, shape index: {}]   ;;  %s1378_s1 = inlined_call_operand.hbm [shape: bf16[8,144], index: 1, kind: input, shape index: {}]   ;;  %s1379_s2 = inlined_call_operand.vmem [shape: f32[8,1], index: 2, kind: input, shape index: {}]   ;;  %s1380_s3 = inlined_call_operand.vmem [shape: f32[8,256], index: 3, kind: input, shape index: {}]   ;;  %s1381_s4 = inlined_call_operand.hbm [shape: f32[2,8,256], index: 4, kind: output, shape index: {}]  }
   0x1   :  { %11 = vsyncpa [#allocation4 + $0x1], 0 }
   0x2   :  { %12 = vsyncpa [#allocation7], 0 }
   0x3   :  { %13 = vsyncpa [#allocation5], 0 }
   0x4   :  { %15 = vsyncpa [#allocation5 + $0x1], 0  ;;  %s1049_s15 = smov 0   ;;  %s1051_s16 = smov 0  }
   0x5   :  { %s1053_s17 = smov 0   ;;  %s1055_s18 = smov 0  }
   0x6   :  { %s1057_s19 = smov 0   ;;  %s1059_s20 = smov 0  }
   0x7 LB: > { %s721_s21 = sadd.s32 4294967295, %s1003_s20   ;;  %s722_s22 = sadd.s32 4294967294, %s1003_s20   ;;  %s1003_s20 = sphi %s1059_s20, %s21_s20   ;;  %s999_s19 = sphi %s1057_s19, %s1415_s19   ;;  %s995_s18 = sphi %s1055_s18, %s1414_s18   ;;  %s991_s17 = sphi %s1053_s17, %s1413_s17   ;;  %s987_s16 = sphi %s1051_s16, %s1412_s16   ;;  %s983_s15 = sphi %s1049_s15, %s1411_s15  }
   0x8   : > { %s40_s23 = sadd.s32 1, %s991_s17  ;;  %p47_p0 = scmp.ne.s32.totalorder %s991_s17, %s987_s16 }
   0x9   : > { %p48_p1 = scmp.eq.s32.totalorder %s1003_s20, 0  ;;  %p53_p2 = scmp.ne.s32.totalorder %s987_s16, %s983_s15 }
   0xa   : > { %p1087_p3 = scmp.eq.s32.totalorder %s721_s21, 0  ;;  %p142_p4 = scmp.eq.s32.totalorder %s721_s21, 1 }
   0xb   : > { %p1091_p5 = por %p48_p1, %p47_p0  ;;  %p148_p6 = scmp.eq.s32.totalorder %s722_s22, 1 }
   0xc   : > { %s1388_s24 = scalar_select %p1087_p3, 1, 0 }
   0xd   : > { %p1097_p7 = por %p1087_p3, %p53_p2  ;;  %p1101_p8 = por %p142_p4, %p47_p0 }
   0xe   : > { %p1105_p9 = por %p148_p6, %p53_p2  ;;  %p723_p10 = scmp.ge.s32.totalorder %s1003_s20, 1 }
   0xf   : > { %s1390_s26 = scalar_select %p1097_p7, 1, 0 }
  0x10   : > { %s1391_s27 = scalar_select %p1101_p8, 1, 0 }
  0x11   : > { %s1392_s28 = scalar_select %p1105_p9, 1, 0 }
  0x12   : > { %p155_p11 = scmp.lt.s32.totalorder %s1003_s20, 3  ;;  %s1005_s30 = smov [#allocation6]  }
  0x13   : > { %s168_s5 = sshll.u32 %s1005_s30, 4  ;;  %p784_p1 = scmp.lt.s32.totalorder %s1003_s20, 2  ;;  %s169_s5 = int_to_ptr.vmem [resolvable:$true] %s168_s5 }
  0x14   : > { %p1112_p13 = pnand %p723_p10, %p155_p11  ;;  %s33_s8 = sadd.s32 1, %s999_s19 }
  0x15   : > { %p1121_p4 = pnand %p784_p1, %p1091_p5  ;;  %p1132_p6 = scmp.ge.s32.totalorder %s33_s8, 2 }
  0x16   : > { %s1393_s29 = scalar_select %p1112_p13, 1, 0 }
  0x17   : > { %p771_p0 = pneg %p1112_p13  ;;  %s185_s10 = sand.u32 1, %s991_s17  }
  0x18   : > { %s1394_s6 = scalar_select %p1121_p4, 1, 0 }
  0x19   : > { %p1127_p2 = pnand %p771_p0, %p1087_p3  ;;  %s859_s13 = scalar_lea.hbm %s1378_s1, 128 }
  0x1a   : > { %s1396_s9 = scalar_select %p1132_p6, 1, 0 }
  0x1b   : > { %p860_p5 = scmp.ne.s32.totalorder %s1378_s1, %s859_s13  ;;  %p861_p10 = pneg %p1127_p2 }
  0x1c   : > { %p866_p0 = scmp.lt.u32.totalorder %s859_s13, %s1378_s1 }
  0x1d   : > { %p862_p11 = pnand %p861_p10, %p860_p5 }
  0x1f   : > { %p863_p1 = pneg %p862_p11 }
  0x21   : > { %p868_p12 = pnand %p866_p0, %p863_p1 }
  0x23   : > { %871 = shalt.err (!%p868_p12)
}
  0x24   : > { %s872_s30 = scalar_lea.vmem %s169_s5, 128  ;;  %p880_p7 = scmp.lt.s32.totalorder %s169_s5, %s169_s5 }
  0x25   : > { %p873_p9 = scmp.ne.s32.totalorder %s169_s5, %s872_s30  ;;  %p881_p13 = scmp.lt.s32.totalorder %s872_s30, %s872_s30 }
  0x27   : > { %p875_p8 = pnand %p873_p9, %p861_p10  ;;  %p882_p4 = por %p881_p13, %p880_p7 }
  0x29   : > { %p876_p3 = pneg %p875_p8 }
  0x2b   : > { %p883_p6 = pnand %p882_p4, %p876_p3 }
  0x2d   : > { %886 = shalt.err (!%p883_p6)
}
  0x2e   : > { %774 = dma.hbm_to_vmem [thread:$0]  (!%p1127_p2), %s1378_s1, 128, %s169_s5, [#allocation7]  }
  0x2f   : > { %p1397_p9 = scmp.ne.s32.totalorder %s1396_s9, 0  ;;  %s760_s13 = smul.u32 24, %s185_s10 }
  0x30   : > { %s761_s21 = smul.u32 384, %s999_s19  ;;  %s1172_s9 = scalar_lea.sflag [#allocation4], %s185_s10 }
  0x31   : > { %s1417_s8 = smov (%p1397_p9, %s33_s8), 0  ;;  %s189_s30 = scalar_lea.vmem [#allocation3], %s760_s13 }
  0x32   : > { %s37_s14 = ssub.s32 %s999_s19, %s1417_s8  ;;  %s1163_s25 = scalar_lea.hbm %s1377_s0, %s761_s21 }
  0x33   : > { %p38_p3 = scmp.eq.s32.totalorder %s37_s14, 0  ;;  %s196_s11 = sshll.u32 %s189_s30, 4  ;;  %s1170_s11 = int_to_ptr.vmem [resolvable:$true] %s196_s11 }
  0x34   : > { %s887_s12 = scalar_lea.hbm %s1163_s25, 384  ;;  %p1398_p8 = scmp.ne.s32.totalorder %s1394_s6, 0 }
  0x35   : > { %s1168_s5 = scalar_select %p38_p3, %s991_s17, %s40_s23  }
  0x36   : > { %p888_p7 = scmp.ne.s32.totalorder %s1163_s25, %s887_s12  ;;  %p889_p12 = pneg %p1398_p8 }
  0x37   : > { %s892_s13 = scalar_lea.hbm %s1377_s0, 768  ;;  %p893_p2 = scmp.lt.u32.totalorder %s1163_s25, %s1377_s0 }
  0x38   : > { %p890_p13 = pnand %p889_p12, %p888_p7  ;;  %p894_p6 = scmp.lt.u32.totalorder %s892_s13, %s887_s12 }
  0x39   : > { %p896_p10 = scmp.lt.u32.totalorder %s887_s12, %s1163_s25 }
  0x3a   : > { %p891_p4 = pneg %p890_p13  ;;  %p895_p5 = por %p894_p6, %p893_p2 }
  0x3c   : > { %p897_p11 = por %p896_p10, %p895_p5 }
  0x3e   : > { %p898_p1 = pnand %p897_p11, %p891_p4 }
  0x40   : > { %901 = shalt.err (!%p898_p1)
}
  0x41   : > { %s902_s23 = scalar_lea.vmem %s1170_s11, 384  ;;  %s1006_s10 = smov [#allocation3]  }
  0x42   : > { %p903_p0 = scmp.ne.s32.totalorder %s1170_s11, %s902_s23  ;;  %s907_s30 = sshll.u32 %s1006_s10, 4  ;;  %s908_s30 = int_to_ptr.vmem [resolvable:$false] %s907_s30 }
  0x43   : > { %s909_s14 = scalar_lea.vmem %s908_s30, 768  ;;  %p910_p7 = scmp.lt.s32.totalorder %s1170_s11, %s908_s30 }
  0x44   : > { %p905_p9 = pnand %p903_p0, %p889_p12  ;;  %p911_p13 = scmp.lt.s32.totalorder %s909_s14, %s902_s23 }
  0x46   : > { %p906_p3 = pneg %p905_p9  ;;  %p912_p2 = por %p911_p13, %p910_p7 }
  0x48   : > { %p913_p6 = pnand %p912_p2, %p906_p3 }
  0x4a   : > { %916 = shalt.err (!%p913_p6)
}
  0x4b   : > { %s1007_s12 = smov 192   ;;  %s1008_s21 = smov 12  }
  0x4c   : > { %778 = dma.hbm_to_vmem [thread:$0]  (!%p1398_p8), %s1163_s25, 384, %s1170_s11, %s1172_s9, %s1007_s12, %s1007_s12, %s1008_s21  }
  0x4d   : > { %p1399_p12 = scmp.ne.s32.totalorder %s1393_s29, 0 }
  0x4e   : > { %s1203_s13 = sand.u32 (!%p1399_p12), 1, %s987_s16   ;;  %p1400_p4 = scmp.ne.s32.totalorder (!%p1399_p12), %s1390_s26, 0 }
  0x4f   : > { %208 = sbr.rel (%p1399_p12) target bundleno = 609 (0x261), region = 36  ;;  %s211_s22 = scalar_lea.sflag (!%p1399_p12), [#allocation4], %s1203_s13 }
  0x50   : > { %s762_s7 = smul.u32 (!%p1399_p12), 24, %s1203_s13 }
  0x52   : > { %s1207_s23 = scalar_lea.vmem (!%p1399_p12), [#allocation3], %s762_s7 }
  0x56   : > { %970 = dma.done.wait (%p1400_p4), %s211_s22, 384  }
  0x57   : > { %972 = vsyncadd (%p1400_p4), %s211_s22, 4294966912  ;;  %p1401_p8 = scmp.ne.s32.totalorder %s1388_s24, 0 }
  0x59   : > { %974 = dma.done.wait (%p1401_p8), [#allocation7], 128  }
  0x5a   : > { %976 = vsyncadd (%p1401_p8), [#allocation7], 4294967168  ;;  %v257_v0 = vlaneseq  ;;  %v1009_v1 = vmov 0   ;;  %v730_v5 = vld [vmem:[%s1380_s3 + $0x1] ss:$8 sm:$0x3] }
  0x5b   : > { %852 = vset.pattern.permute.xlu1 %v1009_v1  ;;  %853 = vset.pattern.permute.xlu0 %v1009_v1  ;;  %v251_v6 = vld [vmem:[%s1380_s3] ss:$8 sm:$0x3]  ;;  %vm255_vm0 = vcmp.gt.f32.partialorder %v730_v5, 0.0  ;;  %s1010_s24 = smov 18   ;;  %s1011_s11 = smov 2  }
  0x5c   : > { %v258_v2 = vshrl.u32 %v257_v0, 7  ;;  %vm252_vm1 = vcmp.gt.f32.partialorder %v251_v6, 0.0  ;;  %v308_v7 = vsel %vm255_vm0, 1, %v1009_v1  ;;  %v1230_v16 = vld [vmem:[%s1207_s23] sm:$0xff]  ;;  %v1233_v17 = vld [vmem:[%s1207_s23 + $0xc] sm:$0xff]  ;;  %s1012_s9 = smov 32  }
  0x5d   : > { %v256_v8 = vsel %vm252_vm1, 1, %v1009_v1  ;;  %s1013_s10 = smov 16   ;;  %v1237_v18 = vcombine.high %v1230_v16, %v1233_v17  ;;  %v1240_v19 = vld [vmem:[%s1207_s23 + $0x8] sm:$0xf]  ;;  %v1243_v20 = vld [vmem:[%s1207_s23 + $0x14] sm:$0xf]  ;;  %v1252_v22 = vcombine.low %v1230_v16, %v1233_v17 }
  0x5e   : > { %v259_v3 = vsub.s32 0, %v258_v2  ;;  %v263_v4 = vsub.s32 1, %v258_v2  ;;  %s1014_s30 = smov 34   ;;  %s1015_s14 = smov 127   ;;  %v1248_v21 = vcombine.low %v1240_v19, %v1243_v20  ;;  %vm324_vm9 = vcmask 15360   ;;  %v1309_v14 = vld [vmem:[#allocation6] sm:$0xff] }
  0x5f   : > { %s1016_s12 = smov 111   ;;  %vm362_vm10 = vcmask 130048   ;;  %s1017_s21 = smov 126   ;;  %vm301_vm15 = vcmask 1039360   ;;  %vm412_vm0 = vcmask 146432  }
  0x60   : > { %v312_v9 = vrot.slane %v308_v7, %v259_v3  ;;  %v316_v10 = vrot.slane %v308_v7, %v263_v4  ;;  %v260_v11 = vrot.slane %v256_v8, %v259_v3  ;;  %v264_v12 = vrot.slane %v256_v8, %v263_v4  ;;  %s1018_s7 = smov 96   ;;  %s1019_s22 = smov 112  }
  0x61   : > { %s1020_s23 = smov 110   ;;  %s1021_s29 = smov 95  }
  0x62   : > { %vm317_vm2 = vcmp.eq.s32.totalorder %v312_v9, 1  ;;  %vm318_vm3 = vcmp.eq.s32.totalorder %v316_v10, 1  ;;  %vm265_vm4 = vcmp.eq.s32.totalorder %v260_v11, 1  ;;  %vm266_vm5 = vcmp.eq.s32.totalorder %v264_v12, 1  ;;  %s1022_s6 = smov 94   ;;  %p1408_p10 = scmp.ne.s32.totalorder %s1391_s27, 0 }
  0x63   : > { %vm319_vm6 = vmpackc.low %vm318_vm3, %vm317_vm2  ;;  %vm449_vm3 = vcmask 261120  }
  0x64   : > { %v320_v13 = vsel %vm319_vm6, 65537, %v1009_v1  ;;  %vm1223_vm7 = vmpackc.low %vm266_vm5, %vm265_vm4  ;;  %vm499_vm5 = vcmask 277504  }
  0x65   : > { %409 = vrot.lane.b32.xlu1 %v320_v13, %s1010_s24  ;;  %321 = vrot.lane.b32.xlu0 %v320_v13, %s1011_s11  ;;  %v358_v15 = vsel %vm1223_vm7, 65537, %v1009_v1  ;;  %v268_v23 = vsel %vm1223_vm7, %v1230_v16, 0  ;;  %v269_v24 = vsel %vm1223_vm7, %v1233_v17, 0  ;;  %s729_s24 = sshll.u32 %s1203_s13, 4  ;;  %s759_s11 = sshll.u32 %s995_s18, 8 }
  0x66   : > { %v732_v25 = vcombine.high %v268_v23, %v269_v24  ;;  %v731_v26 = vcombine.low %v268_v23, %v269_v24  ;;  %s614_s18 = scalar_lea.sflag [#allocation5], %s1203_s13 }
  0x68   : > { %568 = vmatprep.subr.bf16.mxu0 %v732_v25 }
  0x69   : > { %446 = vrot.lane.b32.xlu1 %v358_v15, %s1012_s9  ;;  %359 = vrot.lane.b32.xlu0 %v358_v15, %s1013_s10  ;;  %v752_v15 = vcombine.high %v1309_v14, %v1309_v14  ;;  %s242_s9 = scalar_lea.vmem [#allocation8], %s729_s24 }
  0x6a   : > { %569 = vmatpush1.bf16.msra.mxu0 %v731_v26  ;;  %s630_s10 = sshll.u32 %s242_s9, 4  ;;  %s1330_s10 = int_to_ptr.vmem [resolvable:$true] %s630_s10 }
  0x6b   : > { %753 = vmatprep.mubr.msk.bf16.mxu0 %vm362_vm10, %v752_v15 }
  0x6d   : > { %496 = vrot.lane.b32.xlu0 %v320_v13, %s1014_s30  ;;  %297 = vrot.lane.b32.xlu1 %v1237_v18, %s1015_s14 }
  0x71   : > { %299 = vrot.lane.b32.xlu0 %v1248_v21, %s1015_s14  ;;  %295 = vrot.lane.b32.xlu1 %v1252_v22, %s1015_s14 }
  0x75   : > { %398 = vrot.lane.b32.xlu0 %v1237_v18, %s1016_s12  ;;  %400 = vrot.lane.b32.xlu1 %v1248_v21, %s1016_s12 }
  0x79   : > { %396 = vrot.lane.b32.xlu0 %v1252_v22, %s1016_s12  ;;  %s1328_s12 = scalar_lea.hbm %s1381_s4, %s759_s11 }
  0xd7   : > { %v410_v27 = vpop.permute.xlu1 %409  ;;  %v322_v28 = vpop.permute.xlu0 %321 }
  0xd8   : > { %v323_v29 = vrot.slane %v322_v28, 4  ;;  %v411_v45 = vrot.slane %v410_v27, 4 }
  0xda   : > { %vm327_vm8 = vcmp.ne.s16.totalorder %v323_v29, 0  ;;  %v325_v36 = vsel %vm324_vm9, %v323_v29, %v322_v28  ;;  %v413_v57 = vsel %vm412_vm0, %v411_v45, %v410_v27  ;;  %vm415_vm2 = vcmp.ne.s16.totalorder %v411_v45, 0 }
  0xdb   : > { %v447_v30 = vpop.permute.xlu1 %446  ;;  %v360_v31 = vpop.permute.xlu0 %359  ;;  %v329_v32 = vsel %vm327_vm8, %v1240_v19, 0  ;;  %v331_v33 = vsel %vm327_vm8, %v1243_v20, 0  ;;  %vm326_vm14 = vcmp.ne.s16.totalorder %v325_v36, 0  ;;  %vm414_vm1 = vcmp.ne.s16.totalorder %v413_v57, 0 }
  0xdc   : > { %v448_v34 = vrot.slane %v447_v30, 4  ;;  %v361_v35 = vrot.slane %v360_v31, 4  ;;  %v738_v37 = vcombine.low %v329_v32, %v331_v33  ;;  %v328_v54 = vsel %vm326_vm14, %v1230_v16, 0 }
  0xdd   : > { %v330_v55 = vsel %vm326_vm14, %v1233_v17, 0  ;;  %v416_v62 = vsel %vm414_vm1, %v1230_v16, 0  ;;  %v418_v63 = vsel %vm414_vm1, %v1233_v17, 0  ;;  %v417_v1 = vsel %vm415_vm2, %v1240_v19, 0 }
  0xde   : > { %vm1267_vm11 = vcmp.ne.s16.totalorder %v448_v34, 0  ;;  %v363_v39 = vsel %vm362_vm10, %v361_v35, %v360_v31  ;;  %vm1272_vm12 = vcmp.ne.s16.totalorder %v361_v35, 0  ;;  %349 = vrot.lane.b32.xlu1 %v738_v37, %s1017_s21  ;;  %v737_v60 = vcombine.high %v328_v54, %v330_v55 }
  0xdf   : > { %v497_v41 = vpop.permute.xlu0 %496  ;;  %v298_v42 = vpop.permute.xlu1 %297  ;;  %v454_v43 = vsel %vm1267_vm11, %v1240_v19, 0  ;;  %v456_v44 = vsel %vm1267_vm11, %v1243_v20, 0  ;;  %vm364_vm13 = vcmp.ne.s16.totalorder %v363_v39, 0  ;;  %v367_v46 = vsel %vm1272_vm12, %v1240_v19, 0 }
  0xe0   : > { %v369_v47 = vsel %vm1272_vm12, %v1243_v20, 0  ;;  %v747_v48 = vcombine.low %v454_v43, %v456_v44  ;;  %v366_v49 = vsel %vm364_vm13, %v1230_v16, 0  ;;  %v368_v50 = vsel %vm364_vm13, %v1233_v17, 0 }
  0xe1   : > { %v741_v51 = vcombine.low %v367_v46, %v369_v47  ;;  %v740_v59 = vcombine.high %v366_v49, %v368_v50  ;;  %v739_v61 = vcombine.low %v366_v49, %v368_v50  ;;  %v736_v0 = vcombine.low %v328_v54, %v330_v55 }
  0xe2   : > { %474 = vrot.lane.b32.xlu1 %v747_v48, %s1018_s7  ;;  %v419_v2 = vsel %vm415_vm2, %v1243_v20, 0  ;;  %v450_v3 = vsel %vm449_vm3, %v448_v34, %v447_v30  ;;  %v743_v4 = vcombine.high %v416_v62, %v418_v63  ;;  %v742_v6 = vcombine.low %v416_v62, %v418_v63 }
  0xe3   : > { %v300_v52 = vpop.permute.xlu0 %299  ;;  %v296_v53 = vpop.permute.xlu1 %295  ;;  %387 = vrot.lane.b32.xlu0 %v741_v51, %s1019_s22  ;;  %v744_v5 = vcombine.low %v417_v1, %v419_v2  ;;  %vm451_vm4 = vcmp.ne.s16.totalorder %v450_v3, 0  ;;  %v498_v7 = vrot.slane %v497_v41, 4  ;;  %vm351_vm8 = vcmask 1031168  }
  0xe4   : > { %v303_v56 = vsel %vm301_vm15, %v298_v42, %v300_v52  ;;  %v302_v58 = vsel %vm301_vm15, %v296_v53, %v298_v42  ;;  %v453_v8 = vsel %vm451_vm4, %v1230_v16, 0  ;;  %v455_v9 = vsel %vm451_vm4, %v1233_v17, 0 }
  0xe5   : > { %570 = vmatprep.subr.bf16.mxu0 %v303_v56  ;;  %v500_v10 = vsel %vm499_vm5, %v498_v7, %v497_v41  ;;  %vm502_vm6 = vcmp.ne.s16.totalorder %v498_v7, 0  ;;  %v746_v11 = vcombine.high %v453_v8, %v455_v9  ;;  %v745_v23 = vcombine.low %v453_v8, %v455_v9 }
  0xe6   : > { %571 = vmatpush1.bf16.msra.mxu0 %v302_v58  ;;  %385 = vrot.lane.b32.xlu1 %v740_v59, %s1019_s22  ;;  %vm501_vm7 = vcmp.ne.s16.totalorder %v500_v10, 0  ;;  %v504_v12 = vsel %vm502_vm6, %v1240_v19, 0  ;;  %v506_v13 = vsel %vm502_vm6, %v1243_v20, 0  ;;  %v552_v20 = vld [vmem:[%s1379_s2] sm:$0xff]  ;;  %vm389_vm9 = vcmask 916480  }
  0xe7   : > { %347 = vrot.lane.b32.xlu0 %v737_v60, %s1017_s21  ;;  %v505_v24 = vsel %vm501_vm7, %v1233_v17, 0  ;;  %v399_v17 = vpop.permute.xlu0 %398  ;;  %vm402_vm10 = vcmask 908288   ;;  %vm439_vm11 = vcmask 900096   ;;  %vm476_vm12 = vcmask 785408  }
  0xe8   : > { %vm489_vm13 = vcmask 777216   ;;  %vm526_vm14 = vcmask 769024   ;;  %v751_v58 = vcombine.low %v1309_v14, %v1309_v14 }
  0xea   : > { %383 = vrot.lane.b32.xlu1 %v739_v61, %s1019_s22 }
  0xeb   : > { %345 = vrot.lane.b32.xlu0 %v736_v0, %s1017_s21  ;;  %s917_s21 = scalar_lea.vmem %s1330_s10, 256 }
  0xec   : > { %p918_p5 = scmp.ne.s32.totalorder %s1330_s10, %s917_s21 }
  0xee   : > { %435 = vrot.lane.b32.xlu1 %v743_v4, %s1020_s23  ;;  %p919_p11 = pnand %p918_p5, %p1408_p10 }
  0xef   : > { %437 = vrot.lane.b32.xlu0 %v744_v5, %s1020_s23 }
  0xf0   : > { %p920_p1 = pneg %p919_p11 }
  0xf2   : > { %433 = vrot.lane.b32.xlu1 %v742_v6, %s1020_s23 }
  0xf3   : > { %487 = vrot.lane.b32.xlu0 %v1248_v21, %s1021_s29  ;;  %v503_v21 = vsel %vm501_vm7, %v1230_v16, 0  ;;  %v401_v16 = vpop.permute.xlu1 %400 }
  0xf4   : > { %v749_v19 = vcombine.high %v503_v21, %v505_v24  ;;  %v748_v25 = vcombine.low %v503_v21, %v505_v24  ;;  %v404_v39 = vsel %vm402_vm10, %v399_v17, %v401_v16 }
  0xf6   : > { %485 = vrot.lane.b32.xlu1 %v1237_v18, %s1021_s29  ;;  %v750_v18 = vcombine.low %v504_v12, %v506_v13 }
  0xf7   : > { %472 = vrot.lane.b32.xlu0 %v746_v11, %s1018_s7 }
  0xfa   : > { %483 = vrot.lane.b32.xlu1 %v1252_v22, %s1021_s29  ;;  %v397_v22 = vpop.permute.xlu0 %396 }
  0xfb   : > { %470 = vrot.lane.b32.xlu0 %v745_v23, %s1018_s7  ;;  %v403_v42 = vsel %vm402_vm10, %v397_v22, %v399_v17  ;;  %s1023_s7 = smov [#allocation8]  }
  0xfc   : > { %s921_s22 = sshll.u32 %s1023_s7, 4  ;;  %s922_s22 = int_to_ptr.vmem [resolvable:$false] %s921_s22 }
  0xfd   : > { %s923_s23 = scalar_lea.vmem %s922_s22, 512  ;;  %p924_p0 = scmp.lt.s32.totalorder %s1330_s10, %s922_s22 }
  0xfe   : > { %524 = vrot.lane.b32.xlu1 %v750_v18, %s1022_s6  ;;  %p925_p9 = scmp.lt.s32.totalorder %s923_s23, %s917_s21 }
  0xff   : > { %522 = vrot.lane.b32.xlu0 %v749_v19, %s1022_s6 }
 0x100   : > { %p926_p3 = por %p925_p9, %p924_p0 }
 0x102   : > { %555 = vperm.xlu1 %852, %v552_v20   ;;  %p927_p7 = pnand %p926_p3, %p920_p1 }
 0x103   : > { %520 = vrot.lane.b32.xlu0 %v748_v25, %s1022_s6 }
 0x150   : > { %v350_v26 = vpop.permute.xlu1 %349 }
 0x154   : > { %v475_v27 = vpop.permute.xlu1 %474 }
 0x155   : > { %v388_v28 = vpop.permute.xlu0 %387 }
 0x158   : > { %v386_v29 = vpop.permute.xlu1 %385 }
 0x159   : > { %v348_v30 = vpop.permute.xlu0 %347  ;;  %v391_v35 = vsel %vm389_vm9, %v386_v29, %v388_v28 }
 0x15a   : > { %v353_v31 = vsel %vm351_vm8, %v348_v30, %v350_v26 }
 0x15b   : > { %572 = vmatprep.subr.bf16.mxu0 %v353_v31 }
 0x15c   : > { %v384_v32 = vpop.permute.xlu1 %383 }
 0x15d   : > { %v346_v33 = vpop.permute.xlu0 %345  ;;  %v390_v38 = vsel %vm389_vm9, %v384_v32, %v386_v29 }
 0x15e   : > { %v352_v34 = vsel %vm351_vm8, %v346_v33, %v348_v30 }
 0x15f   : > { %573 = vmatpush1.bf16.msra.mxu0 %v352_v34 }
 0x160   : > { %574 = vmatprep.subr.bf16.mxu0 %v391_v35  ;;  %v436_v36 = vpop.permute.xlu1 %435 }
 0x161   : > { %v438_v37 = vpop.permute.xlu0 %437 }
 0x162   : > { %v441_v43 = vsel %vm439_vm11, %v436_v36, %v438_v37 }
 0x163   : > { %575 = vmatpush1.bf16.msra.mxu0 %v390_v38 }
 0x164   : > { %576 = vmatprep.subr.bf16.mxu0 %v404_v39  ;;  %v434_v40 = vpop.permute.xlu1 %433 }
 0x165   : > { %v488_v41 = vpop.permute.xlu0 %487  ;;  %v440_v46 = vsel %vm439_vm11, %v434_v40, %v436_v36 }
 0x167   : > { %577 = vmatpush1.bf16.msra.mxu0 %v403_v42 }
 0x168   : > { %578 = vmatprep.subr.bf16.mxu0 %v441_v43  ;;  %v486_v44 = vpop.permute.xlu1 %485 }
 0x169   : > { %v473_v45 = vpop.permute.xlu0 %472  ;;  %v491_v51 = vsel %vm489_vm13, %v486_v44, %v488_v41 }
 0x16a   : > { %v478_v47 = vsel %vm476_vm12, %v473_v45, %v475_v27 }
 0x16b   : > { %579 = vmatpush1.bf16.msra.mxu0 %v440_v46 }
 0x16c   : > { %580 = vmatprep.subr.bf16.mxu0 %v478_v47  ;;  %v484_v48 = vpop.permute.xlu1 %483 }
 0x16d   : > { %v471_v49 = vpop.permute.xlu0 %470  ;;  %v490_v54 = vsel %vm489_vm13, %v484_v48, %v486_v44 }
 0x16e   : > { %v477_v50 = vsel %vm476_vm12, %v471_v49, %v473_v45 }
 0x16f   : > { %581 = vmatpush1.bf16.msra.mxu0 %v477_v50 }
 0x170   : > { %582 = vmatprep.subr.bf16.mxu0 %v491_v51  ;;  %v525_v52 = vpop.permute.xlu1 %524 }
 0x171   : > { %v523_v53 = vpop.permute.xlu0 %522 }
 0x172   : > { %v528_v55 = vsel %vm526_vm14, %v523_v53, %v525_v52 }
 0x173   : > { %583 = vmatpush1.bf16.msra.mxu0 %v490_v54 }
 0x174   : > { %584 = vmatprep.subr.bf16.mxu0 %v528_v55 }
 0x175   : > { %v521_v56 = vpop.permute.xlu0 %520 }
 0x176   : > { %v527_v57 = vsel %vm526_vm14, %v521_v56, %v523_v53 }
 0x177   : > { %585 = vmatpush1.bf16.msra.mxu0 %v527_v57 }
 0x17a   : > { %601 = vmatmul.mubr.bf16.vlgmr.msra.gmra.mrb[0].mxu0 %v751_v58 }
 0x181   : > { %v556_v59 = vpop.permute.xlu1 %555 }
 0x24d   : > { %v602_v60 = vpop.f32.mrb[0].mxu0 }
 0x24e   : > { %v603_v61 = vadd.f32 %v602_v60, %v556_v59  ;;  %v604_v62 = vpop.f32.mrb[1].mxu0 }
 0x24f   : > { %v605_v63 = vadd.f32 %v604_v62, %v556_v59  ;;  %v606_v0 = vpop.f32.mrb[2].mxu0 }
 0x250   : > { %v609_v1 = vmax.f32 %v603_v61, 0.0  ;;  %v607_v2 = vpop.f32.mrb[3].mxu0 }
 0x251   : > { %v610_v3 = vmax.f32 %v605_v63, 0.0 }
 0x252   : > { %611 = vst [vmem:[%s242_s9] sm:$0xff] %v609_v1 }
 0x253   : > { %612 = vst [vmem:[%s242_s9 + $0x8] sm:$0xff] %v610_v3 }
 0x254   : > { %930 = shalt.err (!%p927_p7)
}
 0x255   : > { %s931_s13 = scalar_lea.hbm %s1328_s12, 256  ;;  %s935_s25 = scalar_lea.hbm %s1381_s4, 512 }
 0x256   : > { %p932_p13 = scmp.ne.s32.totalorder %s1328_s12, %s931_s13  ;;  %p936_p12 = scmp.lt.u32.totalorder %s1328_s12, %s1381_s4 }
 0x257   : > { %p937_p4 = scmp.lt.u32.totalorder %s935_s25, %s931_s13  ;;  %p939_p5 = scmp.lt.u32.totalorder %s931_s13, %s1328_s12 }
 0x258   : > { %p933_p2 = pnand %p932_p13, %p1408_p10 }
 0x259   : > { %p938_p8 = por %p937_p4, %p936_p12 }
 0x25a   : > { %p934_p6 = pneg %p933_p2 }
 0x25b   : > { %p940_p11 = por %p939_p5, %p938_p8 }
 0x25d   : > { %p941_p1 = pnand %p940_p11, %p934_p6 }
 0x25f   : > { %944 = shalt.err (!%p941_p1)
}
 0x260   : > { %769 = dma.vmem_to_hbm [thread:$0]  (%p1408_p10), %s1330_s10, 256, %s1328_s12, %s614_s18  }
 0x261 PF: > { %s642_s11 = sand.u32 1, %s983_s15   ;;  %p1409_p0 = scmp.ne.s32.totalorder %s1392_s28, 0 }
 0x262   : > { %p1410_p9 = scmp.ge.s32.totalorder %s1003_s20, 2  ;;  %s643_s9 = scalar_lea.sflag [#allocation5], %s642_s11 }
 0x264   : > { %p780_p3 = pnand %p1410_p9, %p1409_p0 }
 0x266   : > { %978 = dma.done.wait (!%p780_p3), %s643_s9, 256  }
 0x267   : > { %980 = vsyncadd (!%p780_p3), %s643_s9, 4294967040  ;;  %s21_s20 = sadd.s32 1, %s1003_s20   ;;  %s1411_s15 = smov %s987_s16 }
 0x268   : > { %p18_p7 = scmp.ge.s32.totalorder %s21_s20, 4   ;;  %s1412_s16 = smov %s991_s17 }
 0x269   : > { %s1413_s17 = smov %s1168_s5  ;;  %s1414_s18 = smov %s999_s19 }
 0x26a   : > { %s1415_s19 = smov %s1417_s8  ;;  %20 = sbr.rel (!%p18_p7) target bundleno = 7 (0x7), region = 86 }
 0x271   :  { %648 = vsyncpa [#allocation4], 1 }
 0x272   :  { %650 = vsyncpa [#allocation4 + $0x1], 1 }
 0x273   :  { %651 = vsyncpa [#allocation7], 1 }
 0x274   :  { %652 = vsyncpa [#allocation5], 1 }
 0x275   :  { %654 = vsyncpa [#allocation5 + $0x1], 1 }

</bundles_post_ra>
